<compile_context>
chip_gen: v7x
topology: tpu7x:2x2x1
jax: 0.10.0
libtpu: 0.0.40
codegen_flags: <defaults>
</compile_context>

<pallas_src>
import jax
import jax.numpy as jnp
from jax.experimental import pallas as pl
from jax.experimental.pallas import tpu as pltpu

LANES = 128  # vreg lane width; all hidden/output activations are padded to this.


def lf_dnn_kernel(a_ref, v_ref, t_ref, wa_ref, wv_ref, wt_ref, wf_ref, b_ref,
                  out_ref):
  """a:(B,Da) v:(B,Dv) t:(B,Dt) -> out:(B,128) = [features|emos|vals|0]."""
  f32, bf16 = jnp.float32, jnp.bfloat16
  n = wf_ref.shape[1]                      # 128

  # Static, tile-aligned views into the packed fusion/head weight slab (free).
  w1 = wf_ref[0:n, :]                      # post_fusion_layer_1 (lane-padded)
  w2 = wf_ref[n:2 * n, :]                  # post_fusion_layer_2 (lane-padded)
  w_head = wf_ref[2 * n:3 * n, :]          # [0 | Wo1 | Wo2 | 0]

  # Fused encoders: three K-band dots accumulate directly into the lane-dense
  # (B, 128) value [audio_h | video_h | text_h | 0]; the torch.cat is implicit
  # in the per-modality lane offsets baked into wa/wv/wt at pack time.
  h = jnp.dot(a_ref[...].astype(bf16), wa_ref[...], preferred_element_type=f32)
  h = h + jnp.dot(v_ref[...].astype(bf16), wv_ref[...],
                  preferred_element_type=f32)
  h = h + jnp.dot(t_ref[...].astype(bf16), wt_ref[...],
                  preferred_element_type=f32)
  h = jnp.maximum(h + b_ref[0:1, :], 0.0)

  # x1 = [relu(post_fusion_layer_1) | 0]
  x1 = jnp.maximum(
      jnp.dot(h.astype(bf16), w1, preferred_element_type=f32) + b_ref[1:2, :],
      0.0)
  # feats = [features | 0]
  feats = jnp.maximum(
      jnp.dot(x1.astype(bf16), w2, preferred_element_type=f32) + b_ref[2:3, :],
      0.0)

  # out = [features | emos_out | vals_out | 0]. `features` passes through
  # exactly in f32 (no identity-matmul bf16 rounding); the head matmul only
  # produces the emos/vals lanes, so a single lane-dense unmasked store emits
  # all three outputs.
  head = jnp.dot(feats.astype(bf16), w_head, preferred_element_type=f32)
  out_ref[...] = feats + head + b_ref[3:4, :]


def lf_dnn_forward(batch, packed, *, block_b=256):
  """Runs the fused Pallas kernel. `packed` comes from pack_params()."""
  a = batch["audios"].astype(jnp.float32)
  v = batch["videos"].astype(jnp.float32)
  t = batch["texts"].astype(jnp.float32)
  B = a.shape[0]
  H, O1, O2 = packed["hidden"], packed["out1"], packed["out2"]
  weights = (packed["wa_p"], packed["wv_p"], packed["wt_p"],
             packed["wf_pack"], packed["b_pack"])

  d_in = a.shape[1] + v.shape[1] + t.shape[1]
  flops = 2 * B * (d_in * LANES + 3 * LANES * LANES)
  bytes_accessed = (4 * (a.size + v.size + t.size + B * LANES)
                    + sum(int(w.size) * w.dtype.itemsize for w in weights))
  cost = pl.CostEstimate(flops=flops, transcendentals=0,
                         bytes_accessed=bytes_accessed)
  out_shape = jax.ShapeDtypeStruct((B, LANES), jnp.float32)

  if B >= 2 * block_b and B % block_b == 0:
    # Batched path: tile over the batch; packed weights use a constant block
    # index so they are DMA'd once and stay VMEM-resident across grid steps;
    # the "parallel" axis lets megacore (v7x) shard rows across TensorCores.
    data_spec = lambda d: pl.BlockSpec((block_b, d), lambda i: (i, 0))
    in_specs = ([data_spec(a.shape[1]), data_spec(v.shape[1]),
                 data_spec(t.shape[1])]
                + [pl.BlockSpec(w.shape, lambda i: (0, 0)) for w in weights])
    out = pl.pallas_call(
        lf_dnn_kernel,
        out_shape=out_shape,
        grid_spec=pltpu.PrefetchScalarGridSpec(
            num_scalar_prefetch=0,
            grid=(B // block_b,),
            in_specs=in_specs,
            out_specs=pl.BlockSpec((block_b, LANES), lambda i: (i, 0))),
        compiler_params=pltpu.CompilerParams(
            dimension_semantics=("parallel",)),
        cost_estimate=cost,
    )(a, v, t, *weights)
  else:
    # Small-batch path: no grid, no pipeline — every operand is a whole-array
    # VMEM block (one DMA each), single kernel invocation.
    out = pl.pallas_call(
        lf_dnn_kernel,
        out_shape=out_shape,
        in_specs=[pl.BlockSpec(memory_space=pltpu.MemorySpace.VMEM)] * 8,
        out_specs=pl.BlockSpec(memory_space=pltpu.MemorySpace.VMEM),
        cost_estimate=cost,
    )(a, v, t, *weights)

  features = out[:, :H]
  emos_out = out[:, H:H + O1]
  vals_out = out[:, H + O1:H + O1 + O2]
  interloss = jnp.zeros((), jnp.int32)     # torch.tensor(0)
  return features, emos_out, vals_out, interloss


# ----------------------------------------------------------------------------
# Parameter construction / packing (trace/init time, outside the kernel).
# ----------------------------------------------------------------------------
def _init_linear(key, in_dim, out_dim):
  """PyTorch nn.Linear default init: U(-1/sqrt(fan_in), 1/sqrt(fan_in))."""
  k1, k2 = jax.random.split(key)
  bound = 1.0 / float(in_dim) ** 0.5
  w = jax.random.uniform(k1, (in_dim, out_dim), jnp.float32, -bound, bound)
  b = jax.random.uniform(k2, (out_dim,), jnp.float32, -bound, bound)
  return w, b


def init_raw_params(key, text_dim, audio_dim, video_dim, hidden_dim, out1, out2):
  keys = jax.random.split(key, 7)
  wa, ba = _init_linear(keys[0], audio_dim, hidden_dim)
  wv, bv = _init_linear(keys[1], video_dim, hidden_dim)
  wt, bt = _init_linear(keys[2], text_dim, hidden_dim)
  w1, b1 = _init_linear(keys[3], 3 * hidden_dim, hidden_dim)
  w2, b2 = _init_linear(keys[4], hidden_dim, hidden_dim)
  wo1, bo1 = _init_linear(keys[5], hidden_dim, out1)
  wo2, bo2 = _init_linear(keys[6], hidden_dim, out2)
  return dict(wa=wa, ba=ba, wv=wv, bv=bv, wt=wt, bt=bt,
              w1=w1, b1=b1, w2=w2, b2=b2,
              wo1=wo1, bo1=bo1, wo2=wo2, bo2=bo2)


def pack_params(p, audio_dim, video_dim, text_dim, hidden_dim, out1, out2):
  """Packs all 14 weight/bias tensors into the kernel's 5 operands (bf16 W)."""
  H = hidden_dim
  assert 3 * H <= LANES and H + out1 + out2 <= LANES
  bf16, f32 = jnp.bfloat16, jnp.float32

  # Per-modality encoder weights, each broadcast to full 128 lanes with the
  # concat offset baked in: x_a @ wa_p lands in lanes 0:H, video in H:2H, ...
  wa_p = jnp.zeros((audio_dim, LANES), bf16).at[:, 0:H].set(p["wa"].astype(bf16))
  wv_p = jnp.zeros((video_dim, LANES), bf16).at[:, H:2 * H].set(p["wv"].astype(bf16))
  wt_p = jnp.zeros((text_dim, LANES), bf16).at[:, 2 * H:3 * H].set(p["wt"].astype(bf16))

  w1 = jnp.zeros((LANES, LANES), bf16).at[0:3 * H, 0:H].set(p["w1"].astype(bf16))
  w2 = jnp.zeros((LANES, LANES), bf16).at[0:H, 0:H].set(p["w2"].astype(bf16))
  # Output head only: [0 | Wo1 | Wo2 | 0]; features pass through in f32 via add.
  w_head = jnp.zeros((LANES, LANES), bf16)
  w_head = w_head.at[0:H, H:H + out1].set(p["wo1"].astype(bf16))
  w_head = w_head.at[0:H, H + out1:H + out1 + out2].set(p["wo2"].astype(bf16))
  wf_pack = jnp.concatenate([w1, w2, w_head], axis=0)   # (384, 128) bf16

  b_pack = jnp.zeros((8, LANES), f32)
  b_pack = b_pack.at[0, 0:3 * H].set(
      jnp.concatenate([p["ba"], p["bv"], p["bt"]]))
  b_pack = b_pack.at[1, 0:H].set(p["b1"])
  b_pack = b_pack.at[2, 0:H].set(p["b2"])
  b_pack = b_pack.at[3, H:H + out1].set(p["bo1"])
  b_pack = b_pack.at[3, H + out1:H + out1 + out2].set(p["bo2"])

  return dict(wa_p=wa_p, wv_p=wv_p, wt_p=wt_p, wf_pack=wf_pack, b_pack=b_pack,
              hidden=H, out1=out1, out2=out2)


def _reference(batch, p):
  """Pure-jnp reference (explicit concat path) for a correctness check."""
  relu = lambda z: jnp.maximum(z, 0.0)
  a_h = relu(batch["audios"] @ p["wa"] + p["ba"])
  v_h = relu(batch["videos"] @ p["wv"] + p["bv"])
  t_h = relu(batch["texts"] @ p["wt"] + p["bt"])
  fusion = jnp.concatenate([a_h, v_h, t_h], axis=-1)
  x = relu(fusion @ p["w1"] + p["b1"])
  features = relu(x @ p["w2"] + p["b2"])
  emos = features @ p["wo1"] + p["bo1"]
  vals = features @ p["wo2"] + p["bo2"]
  return features, emos, vals


if __name__ == "__main__":
  key = jax.random.PRNGKey(0)
  text_dim, audio_dim, video_dim = 48, 40, 56
  hidden_dim = 32
  output_dim1, output_dim2 = 6, 1   # emotion logits, valence regression

  k_params, k_a, k_v, k_t, k_big = jax.random.split(key, 5)
  raw = init_raw_params(k_params, text_dim, audio_dim, video_dim,
                        hidden_dim, output_dim1, output_dim2)
  packed = pack_params(raw, audio_dim, video_dim, text_dim,
                       hidden_dim, output_dim1, output_dim2)

  # Tolerance: weights/activations are bf16 at the MXU (f32 accumulation),
  # matching default TPU matmul precision of the f32 reference.
  tol = dict(atol=2e-2, rtol=2e-2)

  # --- Small batch: gridless whole-array VMEM path ---------------------------
  B = 8
  batch = {
      "audios": jax.random.normal(k_a, (B, audio_dim), jnp.float32),
      "videos": jax.random.normal(k_v, (B, video_dim), jnp.float32),
      "texts": jax.random.normal(k_t, (B, text_dim), jnp.float32),
  }
  features, emos_out, vals_out, interloss = lf_dnn_forward(batch, packed)
  jax.block_until_ready((features, emos_out, vals_out, interloss))

  ref_f, ref_e, ref_v = _reference(batch, raw)
  assert features.shape == (B, hidden_dim)
  assert emos_out.shape == (B, output_dim1)
  assert vals_out.shape == (B, output_dim2)
  assert jnp.allclose(features, ref_f, **tol)
  assert jnp.allclose(emos_out, ref_e, **tol)
  assert jnp.allclose(vals_out, ref_v, **tol)
  assert int(interloss) == 0

  # --- Larger batch: 1-D batch grid, weights VMEM-resident across steps ------
  B2 = 512
  kb_a, kb_v, kb_t = jax.random.split(k_big, 3)
  batch2 = {
      "audios": jax.random.normal(kb_a, (B2, audio_dim), jnp.float32),
      "videos": jax.random.normal(kb_v, (B2, video_dim), jnp.float32),
      "texts": jax.random.normal(kb_t, (B2, text_dim), jnp.float32),
  }
  f2, e2, v2, il2 = lf_dnn_forward(batch2, packed, block_b=256)
  jax.block_until_ready((f2, e2, v2, il2))
  rf2, re2, rv2 = _reference(batch2, raw)
  assert f2.shape == (B2, hidden_dim)
  assert jnp.allclose(f2, rf2, **tol)
  assert jnp.allclose(e2, re2, **tol)
  assert jnp.allclose(v2, rv2, **tol)

  print("KERNEL_OK")
</pallas_src>

<mosaic_0001>
module attributes {stable_mosaic.version = 11 : i64} {
  func.func @lf_dnn_kernel(%arg0: memref<8x40xf32, #tpu.memory_space<vmem>>, %arg1: memref<8x56xf32, #tpu.memory_space<vmem>>, %arg2: memref<8x48xf32, #tpu.memory_space<vmem>>, %arg3: memref<40x128xbf16, #tpu.memory_space<vmem>>, %arg4: memref<56x128xbf16, #tpu.memory_space<vmem>>, %arg5: memref<48x128xbf16, #tpu.memory_space<vmem>>, %arg6: memref<384x128xbf16, #tpu.memory_space<vmem>>, %arg7: memref<8x128xf32, #tpu.memory_space<vmem>>, %arg8: memref<8x128xf32, #tpu.memory_space<vmem>>) attributes {dimension_semantics = [], scalar_prefetch = 0 : i64, scratch_operands = 0 : i64, tpu.core_type = #tpu.core_type<tc>} {
    %c0 = arith.constant 0 : index
    %c0_0 = arith.constant 0 : index
    %0 = vector.load %arg6[%c0, %c0_0] : memref<384x128xbf16, #tpu.memory_space<vmem>>, vector<128x128xbf16>
    %c128 = arith.constant 128 : index
    %c0_1 = arith.constant 0 : index
    %1 = vector.load %arg6[%c128, %c0_1] : memref<384x128xbf16, #tpu.memory_space<vmem>>, vector<128x128xbf16>
    %c256 = arith.constant 256 : index
    %c0_2 = arith.constant 0 : index
    %2 = vector.load %arg6[%c256, %c0_2] : memref<384x128xbf16, #tpu.memory_space<vmem>>, vector<128x128xbf16>
    %c0_3 = arith.constant 0 : index
    %c0_4 = arith.constant 0 : index
    %3 = vector.load %arg0[%c0_3, %c0_4] : memref<8x40xf32, #tpu.memory_space<vmem>>, vector<8x40xf32>
    %4 = arith.truncf %3 : vector<8x40xf32> to vector<8x40xbf16>
    %c0_5 = arith.constant 0 : index
    %c0_6 = arith.constant 0 : index
    %5 = vector.load %arg3[%c0_5, %c0_6] : memref<40x128xbf16, #tpu.memory_space<vmem>>, vector<40x128xbf16>
    %cst = arith.constant dense<0.000000e+00> : vector<8x128xf32>
    %6 = tpu.matmul %4, %5, %cst {dimension_numbers = #tpu.dot_dimension_numbers<[1], [0], [0], [1], [0, 0, 1, 1], [], []>} : vector<8x40xbf16>, vector<40x128xbf16>, vector<8x128xf32> -> vector<8x128xf32>
    %c0_7 = arith.constant 0 : index
    %c0_8 = arith.constant 0 : index
    %7 = vector.load %arg1[%c0_7, %c0_8] : memref<8x56xf32, #tpu.memory_space<vmem>>, vector<8x56xf32>
    %8 = arith.truncf %7 : vector<8x56xf32> to vector<8x56xbf16>
    %c0_9 = arith.constant 0 : index
    %c0_10 = arith.constant 0 : index
    %9 = vector.load %arg4[%c0_9, %c0_10] : memref<56x128xbf16, #tpu.memory_space<vmem>>, vector<56x128xbf16>
    %cst_11 = arith.constant dense<0.000000e+00> : vector<8x128xf32>
    %10 = tpu.matmul %8, %9, %cst_11 {dimension_numbers = #tpu.dot_dimension_numbers<[1], [0], [0], [1], [0, 0, 1, 1], [], []>} : vector<8x56xbf16>, vector<56x128xbf16>, vector<8x128xf32> -> vector<8x128xf32>
    %11 = arith.addf %6, %10 : vector<8x128xf32>
    %c0_12 = arith.constant 0 : index
    %c0_13 = arith.constant 0 : index
    %12 = vector.load %arg2[%c0_12, %c0_13] : memref<8x48xf32, #tpu.memory_space<vmem>>, vector<8x48xf32>
    %13 = arith.truncf %12 : vector<8x48xf32> to vector<8x48xbf16>
    %c0_14 = arith.constant 0 : index
    %c0_15 = arith.constant 0 : index
    %14 = vector.load %arg5[%c0_14, %c0_15] : memref<48x128xbf16, #tpu.memory_space<vmem>>, vector<48x128xbf16>
    %cst_16 = arith.constant dense<0.000000e+00> : vector<8x128xf32>
    %15 = tpu.matmul %13, %14, %cst_16 {dimension_numbers = #tpu.dot_dimension_numbers<[1], [0], [0], [1], [0, 0, 1, 1], [], []>} : vector<8x48xbf16>, vector<48x128xbf16>, vector<8x128xf32> -> vector<8x128xf32>
    %16 = arith.addf %11, %15 : vector<8x128xf32>
    %c0_17 = arith.constant 0 : index
    %c0_18 = arith.constant 0 : index
    %17 = vector.load %arg7[%c0_17, %c0_18] : memref<8x128xf32, #tpu.memory_space<vmem>>, vector<1x128xf32>
    %18 = vector.broadcast %17 : vector<1x128xf32> to vector<8x128xf32>
    %19 = arith.addf %16, %18 : vector<8x128xf32>
    %cst_19 = arith.constant 0.000000e+00 : f32
    %20 = vector.broadcast %cst_19 : f32 to vector<8x128xf32>
    %21 = arith.maximumf %19, %20 : vector<8x128xf32>
    %22 = arith.truncf %21 : vector<8x128xf32> to vector<8x128xbf16>
    %cst_20 = arith.constant dense<0.000000e+00> : vector<8x128xf32>
    %23 = tpu.matmul %22, %0, %cst_20 {dimension_numbers = #tpu.dot_dimension_numbers<[1], [0], [0], [1], [0, 0, 1, 1], [], []>} : vector<8x128xbf16>, vector<128x128xbf16>, vector<8x128xf32> -> vector<8x128xf32>
    %c1 = arith.constant 1 : index
    %c0_21 = arith.constant 0 : index
    %24 = vector.load %arg7[%c1, %c0_21] : memref<8x128xf32, #tpu.memory_space<vmem>>, vector<1x128xf32>
    %25 = vector.broadcast %24 : vector<1x128xf32> to vector<8x128xf32>
    %26 = arith.addf %23, %25 : vector<8x128xf32>
    %cst_22 = arith.constant 0.000000e+00 : f32
    %27 = vector.broadcast %cst_22 : f32 to vector<8x128xf32>
    %28 = arith.maximumf %26, %27 : vector<8x128xf32>
    %29 = arith.truncf %28 : vector<8x128xf32> to vector<8x128xbf16>
    %cst_23 = arith.constant dense<0.000000e+00> : vector<8x128xf32>
    %30 = tpu.matmul %29, %1, %cst_23 {dimension_numbers = #tpu.dot_dimension_numbers<[1], [0], [0], [1], [0, 0, 1, 1], [], []>} : vector<8x128xbf16>, vector<128x128xbf16>, vector<8x128xf32> -> vector<8x128xf32>
    %c2 = arith.constant 2 : index
    %c0_24 = arith.constant 0 : index
    %31 = vector.load %arg7[%c2, %c0_24] : memref<8x128xf32, #tpu.memory_space<vmem>>, vector<1x128xf32>
    %32 = vector.broadcast %31 : vector<1x128xf32> to vector<8x128xf32>
    %33 = arith.addf %30, %32 : vector<8x128xf32>
    %cst_25 = arith.constant 0.000000e+00 : f32
    %34 = vector.broadcast %cst_25 : f32 to vector<8x128xf32>
    %35 = arith.maximumf %33, %34 : vector<8x128xf32>
    %36 = arith.truncf %35 : vector<8x128xf32> to vector<8x128xbf16>
    %cst_26 = arith.constant dense<0.000000e+00> : vector<8x128xf32>
    %37 = tpu.matmul %36, %2, %cst_26 {dimension_numbers = #tpu.dot_dimension_numbers<[1], [0], [0], [1], [0, 0, 1, 1], [], []>} : vector<8x128xbf16>, vector<128x128xbf16>, vector<8x128xf32> -> vector<8x128xf32>
    %38 = arith.addf %35, %37 : vector<8x128xf32>
    %c3 = arith.constant 3 : index
    %c0_27 = arith.constant 0 : index
    %39 = vector.load %arg7[%c3, %c0_27] : memref<8x128xf32, #tpu.memory_space<vmem>>, vector<1x128xf32>
    %40 = vector.broadcast %39 : vector<1x128xf32> to vector<8x128xf32>
    %41 = arith.addf %38, %40 : vector<8x128xf32>
    %c0_28 = arith.constant 0 : index
    %c0_29 = arith.constant 0 : index
    %42 = vector.load %arg8[%c0_28, %c0_29] : memref<8x128xf32, #tpu.memory_space<vmem>>, vector<8x128xf32>
    tpu.vector_store %arg8[%c0_28, %c0_29], %41 {strides = array<i32>} : memref<8x128xf32, #tpu.memory_space<vmem>>, vector<8x128xf32>,
    return
  }
}

</mosaic_0001>

<bundles_post_ra>
// kernel: tpu_custom_call.1
= control target key start
LH: loop header
LB: loop body
LE: loop exit
PB: predicated region body
PF: predicated region fallthrough
CT: control target
= control target key end

     0   :  { %13 = vsyncpa [#allocation3], 0  ;;  %s1340_s0 = inlined_call_operand.hbm [shape: f32[8,40], index: 0, kind: input, shape index: {}]   ;;  %s1341_s1 = inlined_call_operand.hbm [shape: f32[8,56], index: 1, kind: input, shape index: {}]   ;;  %s1342_s2 = inlined_call_operand.hbm [shape: f32[8,48], index: 2, kind: input, shape index: {}]   ;;  %s1343_s3 = inlined_call_operand.hbm [shape: bf16[40,128], index: 3, kind: input, shape index: {}]   ;;  %s1344_s4 = inlined_call_operand.hbm [shape: bf16[56,128], index: 4, kind: input, shape index: {}]   ;;  %s1345_s5 = inlined_call_operand.hbm [shape: bf16[48,128], index: 5, kind: input, shape index: {}]   ;;  %s1346_s6 = inlined_call_operand.hbm [shape: bf16[384,128], index: 6, kind: input, shape index: {}]   ;;  %s1347_s7 = inlined_call_operand.vmem [shape: f32[8,128], index: 7, kind: input, shape index: {}]   ;;  %s1348_s8 = inlined_call_operand.hbm [shape: f32[8,128], index: 8, kind: output, shape index: {}]  }
   0x1   :  { %14 = vsyncpa [#allocation6], 0 }
   0x2   :  { %15 = vsyncpa [#allocation9], 0 }
   0x3   :  { %16 = vsyncpa [#allocation12], 0 }
   0x4   :  { %17 = vsyncpa [#allocation4], 0  ;;  %s1103_s27 = smov [#allocation5]   ;;  %s1104_s29 = smov [#allocation8]  }
   0x5   :  { %s34_s28 = sshll.u32 %s1103_s27, 4  ;;  %s53_s30 = sshll.u32 %s1104_s29, 4  ;;  %s35_s28 = int_to_ptr.vmem [resolvable:$true] %s34_s28  ;;  %s1160_s30 = int_to_ptr.vmem [resolvable:$true] %s53_s30 }
   0x6   :  { %s917_s11 = scalar_lea.hbm %s1341_s1, 128 }
   0x7   :  { %p918_p0 = scmp.ne.s32.totalorder %s1341_s1, %s917_s11  ;;  %p921_p1 = scmp.lt.u32.totalorder %s917_s11, %s1341_s1 }
   0x9   :  { %p923_p2 = pnand %p921_p1, %p918_p0 }
   0xb   :  { %926 = shalt.err (!%p923_p2)
}
   0xc   :  { %s927_s16 = scalar_lea.vmem %s35_s28, 128  ;;  %p932_p4 = scmp.lt.s32.totalorder %s35_s28, %s35_s28 }
   0xd   :  { %p928_p3 = scmp.ne.s32.totalorder %s35_s28, %s927_s16  ;;  %p933_p5 = scmp.lt.s32.totalorder %s927_s16, %s927_s16 }
   0xf   :  { %p934_p6 = por %p933_p5, %p932_p4 }
  0x11   :  { %p935_p7 = pnand %p934_p6, %p928_p3 }
  0x13   :  { %938 = shalt.err (!%p935_p7)
}
  0x14   :  { %37 = dma.hbm_to_vmem [thread:$0]  %s1341_s1, 128, %s35_s28, [#allocation6]  }
  0x15   :  { %s939_s21 = scalar_lea.hbm %s1343_s3, 320 }
  0x16   :  { %p940_p8 = scmp.ne.s32.totalorder %s1343_s3, %s939_s21  ;;  %p943_p9 = scmp.lt.u32.totalorder %s939_s21, %s1343_s3 }
  0x18   :  { %p945_p10 = pnand %p943_p9, %p940_p8 }
  0x1a   :  { %948 = shalt.err (!%p945_p10)
}
  0x1b   :  { %s949_s26 = scalar_lea.vmem %s1160_s30, 320  ;;  %p954_p12 = scmp.lt.s32.totalorder %s1160_s30, %s1160_s30 }
  0x1c   :  { %p950_p11 = scmp.ne.s32.totalorder %s1160_s30, %s949_s26  ;;  %p955_p13 = scmp.lt.s32.totalorder %s949_s26, %s949_s26 }
  0x1e   :  { %p956_p0 = por %p955_p13, %p954_p12 }
  0x20   :  { %p957_p1 = pnand %p956_p0, %p950_p11 }
  0x22   :  { %960 = shalt.err (!%p957_p1)
}
  0x23   :  { %s1105_s1 = smov 64   ;;  %s1106_s27 = smov 4  }
  0x24   :  { %59 = dma.hbm_to_vmem [thread:$0]  %s1343_s3, 320, %s1160_s30, [#allocation9], %s1105_s1, %s1105_s1, %s1106_s27  }
  0x25   :  { %s1107_s9 = smov [#allocation11]   ;;  %s1108_s11 = smov [#allocation2]  }
  0x26   :  { %s77_s10 = sshll.u32 %s1107_s9, 4  ;;  %s24_s12 = sshll.u32 %s1108_s11, 4  ;;  %s78_s10 = int_to_ptr.vmem [resolvable:$true] %s77_s10  ;;  %s25_s12 = int_to_ptr.vmem [resolvable:$true] %s24_s12 }
  0x27   :  { %s961_s15 = scalar_lea.hbm %s1345_s5, 384 }
  0x28   :  { %p962_p2 = scmp.ne.s32.totalorder %s1345_s5, %s961_s15  ;;  %p965_p3 = scmp.lt.u32.totalorder %s961_s15, %s1345_s5 }
  0x2a   :  { %p967_p4 = pnand %p965_p3, %p962_p2 }
  0x2c   :  { %970 = shalt.err (!%p967_p4)
}
  0x2d   :  { %s971_s3 = scalar_lea.vmem %s78_s10, 384  ;;  %p976_p6 = scmp.lt.s32.totalorder %s78_s10, %s78_s10 }
  0x2e   :  { %p972_p5 = scmp.ne.s32.totalorder %s78_s10, %s971_s3  ;;  %p977_p7 = scmp.lt.s32.totalorder %s971_s3, %s971_s3 }
  0x30   :  { %p978_p8 = por %p977_p7, %p976_p6 }
  0x32   :  { %p979_p9 = pnand %p978_p8, %p972_p5 }
  0x34   :  { %982 = shalt.err (!%p979_p9)
}
  0x35   :  { %83 = dma.hbm_to_vmem [thread:$0]  %s1345_s5, 384, %s78_s10, [#allocation12], %s1105_s1, %s1105_s1, %s1106_s27  }
  0x36   :  { %s983_s23 = scalar_lea.hbm %s1340_s0, 128 }
  0x37   :  { %p984_p10 = scmp.ne.s32.totalorder %s1340_s0, %s983_s23  ;;  %p987_p11 = scmp.lt.u32.totalorder %s983_s23, %s1340_s0 }
  0x39   :  { %p989_p12 = pnand %p987_p11, %p984_p10 }
  0x3b   :  { %992 = shalt.err (!%p989_p12)
}
  0x3c   :  { %s993_s29 = scalar_lea.vmem %s25_s12, 128  ;;  %p998_p0 = scmp.lt.s32.totalorder %s25_s12, %s25_s12 }
  0x3d   :  { %p994_p13 = scmp.ne.s32.totalorder %s25_s12, %s993_s29  ;;  %p999_p1 = scmp.lt.s32.totalorder %s993_s29, %s993_s29 }
  0x3f   :  { %p1000_p2 = por %p999_p1, %p998_p0 }
  0x41   :  { %p1001_p3 = pnand %p1000_p2, %p994_p13 }
  0x43   :  { %1004 = shalt.err (!%p1001_p3)
}
  0x44   :  { %27 = dma.hbm_to_vmem [thread:$0]  %s1340_s0, 128, %s25_s12, [#allocation3]  }
  0x45   :  { %s1109_s10 = smov [#allocation7]   ;;  %s1110_s13 = smov [#allocation10]  }
  0x46   :  { %s44_s11 = sshll.u32 %s1109_s10, 4  ;;  %s65_s14 = sshll.u32 %s1110_s13, 4  ;;  %s45_s11 = int_to_ptr.vmem [resolvable:$true] %s44_s11  ;;  %s1221_s14 = int_to_ptr.vmem [resolvable:$true] %s65_s14 }
  0x47   :  { %s1005_s17 = scalar_lea.hbm %s1342_s2, 128 }
  0x48   :  { %p1006_p4 = scmp.ne.s32.totalorder %s1342_s2, %s1005_s17  ;;  %p1009_p5 = scmp.lt.u32.totalorder %s1005_s17, %s1342_s2 }
  0x4a   :  { %p1011_p6 = pnand %p1009_p5, %p1006_p4 }
  0x4c   :  { %1014 = shalt.err (!%p1011_p6)
}
  0x4d   :  { %s1015_s0 = scalar_lea.vmem %s45_s11, 128  ;;  %p1020_p8 = scmp.lt.s32.totalorder %s45_s11, %s45_s11 }
  0x4e   :  { %p1016_p7 = scmp.ne.s32.totalorder %s45_s11, %s1015_s0  ;;  %p1021_p9 = scmp.lt.s32.totalorder %s1015_s0, %s1015_s0 }
  0x50   :  { %p1022_p10 = por %p1021_p9, %p1020_p8 }
  0x52   :  { %p1023_p11 = pnand %p1022_p10, %p1016_p7 }
  0x54   :  { %1026 = shalt.err (!%p1023_p11)
}
  0x55   :  { %47 = dma.hbm_to_vmem [thread:$0]  %s1342_s2, 128, %s45_s11, [#allocation6]  }
  0x56   :  { %s1027_s23 = scalar_lea.hbm %s1344_s4, 448 }
  0x57   :  { %p1028_p12 = scmp.ne.s32.totalorder %s1344_s4, %s1027_s23  ;;  %p1031_p13 = scmp.lt.u32.totalorder %s1027_s23, %s1344_s4 }
  0x59   :  { %p1033_p0 = pnand %p1031_p13, %p1028_p12 }
  0x5b   :  { %1036 = shalt.err (!%p1033_p0)
}
  0x5c   :  { %s1037_s29 = scalar_lea.vmem %s1221_s14, 448  ;;  %p1042_p2 = scmp.lt.s32.totalorder %s1221_s14, %s1221_s14 }
  0x5d   :  { %p1038_p1 = scmp.ne.s32.totalorder %s1221_s14, %s1037_s29  ;;  %p1043_p3 = scmp.lt.s32.totalorder %s1037_s29, %s1037_s29 }
  0x5f   :  { %p1044_p4 = por %p1043_p3, %p1042_p2 }
  0x61   :  { %p1045_p5 = pnand %p1044_p4, %p1038_p1 }
  0x63   :  { %1048 = shalt.err (!%p1045_p5)
}
  0x64   :  { %71 = dma.hbm_to_vmem [thread:$0]  %s1344_s4, 448, %s1221_s14, [#allocation9], %s1105_s1, %s1105_s1, %s1106_s27  }
  0x65   :  { %s1111_s9 = smov [#allocation13]   ;;  %s1049_s15 = scalar_lea.hbm %s1346_s6, 3072 }
  0x66   :  { %s89_s10 = sshll.u32 %s1111_s9, 4  ;;  %p1050_p6 = scmp.ne.s32.totalorder %s1346_s6, %s1049_s15  ;;  %s90_s10 = int_to_ptr.vmem [resolvable:$true] %s89_s10 }
  0x67   :  { %p1053_p7 = scmp.lt.u32.totalorder %s1049_s15, %s1346_s6 }
  0x69   :  { %p1055_p8 = pnand %p1053_p7, %p1050_p6 }
  0x6b   :  { %1058 = shalt.err (!%p1055_p8)
}
  0x6c   :  { %s1059_s3 = scalar_lea.vmem %s90_s10, 3072  ;;  %p1064_p10 = scmp.lt.s32.totalorder %s90_s10, %s90_s10 }
  0x6d   :  { %p1060_p9 = scmp.ne.s32.totalorder %s90_s10, %s1059_s3  ;;  %p1065_p11 = scmp.lt.s32.totalorder %s1059_s3, %s1059_s3 }
  0x6f   :  { %p1066_p12 = por %p1065_p11, %p1064_p10 }
  0x71   :  { %p1067_p13 = pnand %p1066_p12, %p1060_p9 }
  0x73   :  { %1070 = shalt.err (!%p1067_p13)
}
  0x74   :  { %95 = dma.hbm_to_vmem [thread:$0]  %s1346_s6, 3072, %s90_s10, [#allocation12], %s1105_s1, %s1105_s1, %s1106_s27  }
  0x75   :  { %1093 = dma.done.wait [#allocation3], 128  }
  0x76   :  { %1094 = vsyncadd [#allocation3], 4294967168 }
  0x77   :  { %1095 = dma.done.wait [#allocation6], 256  }
  0x78   :  { %1096 = vsyncadd [#allocation6], 4294967040 }
  0x79   :  { %1097 = dma.done.wait [#allocation9], 768  }
  0x7a   :  { %1098 = vsyncadd [#allocation9], 4294966528 }
  0x7b   :  { %1099 = dma.done.wait [#allocation12], 3456  }
  0x7c   :  { %1100 = vsyncadd [#allocation12], 4294963840  ;;  %v1112_v0 = vmov 0.0   ;;  %vm1113_vm0 = vmmov 0   ;;  %v883_v1 = vld [vmem:[#allocation10] sm:$0xff]   ;;  %v884_v2 = vld [vmem:[#allocation10 + $0x8] sm:$0xff]  }
  0x7d   :  { %779 = vmatprep.subr.bf16.mxu1 %v1112_v0  ;;  %787 = vmatprep.mubr.msk.bf16.mxu1 %vm1113_vm0, %v1112_v0  ;;  %v885_v3 = vld [vmem:[#allocation10 + $0x10] sm:$0xff]   ;;  %v886_v4 = vld [vmem:[#allocation10 + $0x18] ss:$0 sps:$4 sm:$0xff]   ;;  %v889_v5 = vld [vmem:[#allocation8 + $0x10] ss:$0 sps:$4 sm:$0xff]   ;;  %vm209_vm1 = vcmask 1043456  }
  0x7e   :  { %811 = vmatprep.subr.bf16.mxu0 %v1112_v0  ;;  %827 = vmatprep.mubr.msk.bf16.mxu0 %vm1113_vm0, %v1112_v0  ;;  %v175_v6 = vld [vmem:[#allocation5] sm:$0xff]  ;;  %vm205_vm2 = vcmask 457728   ;;  %v211_v7 = vsel %vm209_vm1, %v886_v4, 0  ;;  %v273_v8 = vsel %vm209_vm1, %v889_v5, 0  ;;  %v887_v9 = vld [vmem:[#allocation8] sm:$0xff]   ;;  %v888_v11 = vld [vmem:[#allocation8 + $0x8] sm:$0xff]  }
  0x7f   :  { %780 = vmatpush3.bf16.msra.mxu1 %v883_v1  ;;  %v176_v10 = vpack.c.bf16 %v175_v6, %v175_v6  ;;  %v168_v12 = vld [vmem:[#allocation2] sm:$0xff]  ;;  %vm268_vm3 = vcmask 326656   ;;  %v890_v14 = vld [vmem:[#allocation11] sm:$0xff]   ;;  %v891_v15 = vld [vmem:[#allocation11 + $0x8] sm:$0xff]   ;;  %vm341_vm4 = vcmask 392192   ;;  %s1114_s22 = smov [#allocation14]  }
  0x80   :  { %781 = vmatprep.subr.bf16.mxu1 %v1112_v0  ;;  %v169_v13 = vpack.c.bf16 %v168_v12, %v168_v12  ;;  %v892_v16 = vld [vmem:[#allocation11 + $0x10] sm:$0xff]   ;;  %v315_v17 = vld [vmem:[#allocation7] sm:$0xff]  ;;  %v893_v19 = vld [vmem:[#allocation13] sm:$0xff]   ;;  %s686_s23 = sshll.u32 %s1114_s22, 4  ;;  %s687_s23 = int_to_ptr.vmem [resolvable:$true] %s686_s23 }
  0x81   :  { %v316_v18 = vpack.c.bf16 %v315_v17, %v315_v17  ;;  %812 = vmatpush3.bf16.msra.mxu0 %v893_v19  ;;  %v894_v20 = vld [vmem:[#allocation13 + $0x8] sm:$0xff]   ;;  %v895_v21 = vld [vmem:[#allocation13 + $0x10] sm:$0xff]   ;;  %v896_v22 = vld [vmem:[#allocation13 + $0x18] sm:$0xff]   ;;  %s1071_s24 = scalar_lea.vmem %s687_s23, 128  ;;  %p1076_p1 = scmp.lt.s32.totalorder %s687_s23, %s687_s23 }
  0x82   :  { %813 = vmatprep.subr.bf16.mxu0 %v1112_v0  ;;  %v897_v23 = vld [vmem:[#allocation13 + $0x20] sm:$0xff]   ;;  %v898_v24 = vld [vmem:[#allocation13 + $0x28] sm:$0xff]   ;;  %v899_v25 = vld [vmem:[#allocation13 + $0x30] sm:$0xff]   ;;  %p1072_p0 = scmp.ne.s32.totalorder %s687_s23, %s1071_s24  ;;  %p1077_p2 = scmp.lt.s32.totalorder %s1071_s24, %s1071_s24 }
  0x83   :  { %782 = vmatpush3.bf16.msra.mxu1 %v884_v2  ;;  %v900_v26 = vld [vmem:[#allocation13 + $0x38] sm:$0xff]   ;;  %v901_v27 = vld [vmem:[#allocation13 + $0x40] sm:$0xff]   ;;  %v902_v28 = vld [vmem:[#allocation13 + $0x48] sm:$0xff]  }
  0x84   :  { %783 = vmatprep.subr.bf16.mxu1 %v1112_v0  ;;  %v903_v29 = vld [vmem:[#allocation13 + $0x50] sm:$0xff]   ;;  %v904_v30 = vld [vmem:[#allocation13 + $0x58] sm:$0xff]   ;;  %v905_v31 = vld [vmem:[#allocation13 + $0x60] sm:$0xff]   ;;  %p1078_p3 = por %p1077_p2, %p1076_p1 }
  0x85   :  { %814 = vmatpush3.bf16.msra.mxu0 %v894_v20  ;;  %v906_v32 = vld [vmem:[#allocation13 + $0x68] sm:$0xff]   ;;  %v711_v43 = vld [vmem:[%s1347_s7] ss:$0 sm:$0xff]  ;;  %v907_v51 = vld [vmem:[#allocation13 + $0x70] sm:$0xff]  }
  0x86   :  { %815 = vmatprep.subr.bf16.mxu0 %v1112_v0  ;;  %v908_v52 = vld [vmem:[#allocation13 + $0x78] sm:$0xff]   ;;  %v909_v53 = vld [vmem:[#allocation13 + $0x80] sm:$0xff]   ;;  %v910_v54 = vld [vmem:[#allocation13 + $0x88] sm:$0xff]   ;;  %p1079_p4 = pnand %p1078_p3, %p1072_p0 }
  0x87   :  { %784 = vmatpush3.bf16.msra.mxu1 %v885_v3  ;;  %v911_v55 = vld [vmem:[#allocation13 + $0x90] sm:$0xff]   ;;  %v912_v56 = vld [vmem:[#allocation13 + $0x98] sm:$0xff]   ;;  %v913_v57 = vld [vmem:[#allocation13 + $0xa0] sm:$0xff]  }
  0x88   :  { %785 = vmatprep.subr.bf16.mxu1 %v1112_v0  ;;  %v914_v58 = vld [vmem:[#allocation13 + $0xa8] sm:$0xff]   ;;  %v712_v59 = vld [vmem:[%s1347_s7 + $0x1] ss:$0 sm:$0xff]  ;;  %v915_v4 = vld [vmem:[#allocation13 + $0xb0] sm:$0xff]  }
  0x89   :  { %816 = vmatpush3.bf16.msra.mxu0 %v895_v21  ;;  %v916_v5 = vld [vmem:[#allocation13 + $0xb8] sm:$0xff]   ;;  %v721_v6 = vld [vmem:[%s1347_s7 + $0x2] ss:$0 sm:$0xff] }
  0x8a   :  { %817 = vmatprep.subr.bf16.mxu0 %v1112_v0 }
  0x8b   :  { %786 = vmatpush3.bf16.msra.mxu1 %v211_v7 }
  0x8c   :  { %791 = vmatprep.subr.bf16.mxu1 %v1112_v0 }
  0x8d   :  { %818 = vmatpush3.bf16.msra.mxu0 %v896_v22 }
  0x8e   :  { %788 = vmatmul.mubr.msk.bf16.vlgmr.msra.gmra.mrb[0].mxu1 %vm205_vm2, %v176_v10  ;;  %819 = vmatprep.subr.bf16.mxu0 %v1112_v0 }
  0x8f   :  { %792 = vmatpush3.bf16.msra.mxu1 %v887_v9  ;;  %797 = vmatprep.mubr.msk.bf16.mxu1 %vm1113_vm0, %v1112_v0 }
  0x90   :  { %793 = vmatprep.subr.bf16.mxu1 %v1112_v0 }
  0x91   :  { %820 = vmatpush3.bf16.msra.mxu0 %v897_v23 }
  0x92   :  { %821 = vmatprep.subr.bf16.mxu0 %v1112_v0 }
  0x93   :  { %794 = vmatpush3.bf16.msra.mxu1 %v888_v11 }
  0x94   :  { %795 = vmatprep.subr.bf16.mxu1 %v1112_v0 }
  0x95   :  { %822 = vmatpush3.bf16.msra.mxu0 %v898_v24 }
  0x96   :  { %823 = vmatprep.subr.bf16.mxu0 %v1112_v0 }
  0x97   :  { %796 = vmatpush3.bf16.msra.mxu1 %v273_v8 }
  0x98   :  { %801 = vmatprep.subr.bf16.mxu1 %v1112_v0 }
  0x99   :  { %824 = vmatpush3.bf16.msra.mxu0 %v899_v25 }
  0x9a   :  { %798 = vmatmul.mubr.msk.bf16.vlgmr.msra.gmra.mrb[4].mxu1 %vm268_vm3, %v169_v13  ;;  %825 = vmatprep.subr.bf16.mxu0 %v1112_v0 }
  0x9b   :  { %802 = vmatpush3.bf16.msra.mxu1 %v890_v14  ;;  %807 = vmatprep.mubr.msk.bf16.mxu1 %vm1113_vm0, %v1112_v0 }
  0x9c   :  { %803 = vmatprep.subr.bf16.mxu1 %v1112_v0 }
  0x9d   :  { %826 = vmatpush3.bf16.msra.mxu0 %v900_v26 }
  0x9e   :  { %851 = vmatprep.subr.bf16.mxu0 %v1112_v0 }
  0x9f   :  { %804 = vmatpush3.bf16.msra.mxu1 %v891_v15  ;;  %v738_v15 = vld [vmem:[%s1347_s7 + $0x3] ss:$0 sm:$0xff] }
  0xa0   :  { %805 = vmatprep.subr.bf16.mxu1 %v1112_v0 }
  0xa3   :  { %806 = vmatpush3.bf16.msra.mxu1 %v892_v16 }
  0xa4   :  { %831 = vmatprep.subr.bf16.mxu1 %v1112_v0 }
  0xa6   :  { %808 = vmatmul.mubr.msk.bf16.vlgmr.msra.gmra.mrb[8].mxu1 %vm341_vm4, %v316_v18 }
  0xa7   :  { %847 = vmatprep.mubr.msk.bf16.mxu1 %vm1113_vm0, %v1112_v0  ;;  %832 = vmatpush3.bf16.msra.mxu1 %v901_v27 }
  0xa8   :  { %833 = vmatprep.subr.bf16.mxu1 %v1112_v0 }
  0xab   :  { %834 = vmatpush3.bf16.msra.mxu1 %v902_v28 }
  0xac   :  { %835 = vmatprep.subr.bf16.mxu1 %v1112_v0 }
  0xaf   :  { %836 = vmatpush3.bf16.msra.mxu1 %v903_v29 }
  0xb0   :  { %837 = vmatprep.subr.bf16.mxu1 %v1112_v0 }
  0xb3   :  { %838 = vmatpush3.bf16.msra.mxu1 %v904_v30 }
  0xb4   :  { %839 = vmatprep.subr.bf16.mxu1 %v1112_v0 }
  0xb7   :  { %840 = vmatpush3.bf16.msra.mxu1 %v905_v31 }
  0xb8   :  { %841 = vmatprep.subr.bf16.mxu1 %v1112_v0 }
  0xbb   :  { %842 = vmatpush3.bf16.msra.mxu1 %v906_v32 }
  0xbc   :  { %843 = vmatprep.subr.bf16.mxu1 %v1112_v0 }
  0xbf   :  { %844 = vmatpush3.bf16.msra.mxu1 %v907_v51 }
  0xc0   :  { %845 = vmatprep.subr.bf16.mxu1 %v1112_v0 }
  0xc3   :  { %846 = vmatpush3.bf16.msra.mxu1 %v908_v52 }
 0x161   :  { %v247_v33 = vpop.f32.mrb[0].mxu1 }
 0x162   :  { %v789_v34 = vpop.f32.mrb[1].mxu1 }
 0x163   :  { %v250_v35 = vpop.f32.mrb[2].mxu1 }
 0x164   :  { %v790_v36 = vpop.f32.mrb[3].mxu1 }
 0x16d   :  { %v309_v37 = vpop.f32.mrb[4].mxu1 }
 0x16e   :  { %v310_v38 = vadd.f32 %v309_v37, %v247_v33  ;;  %v799_v39 = vpop.f32.mrb[5].mxu1 }
 0x16f   :  { %v312_v40 = vpop.f32.mrb[6].mxu1 }
 0x170   :  { %v800_v41 = vpop.f32.mrb[7].mxu1 }
 0x179   :  { %v379_v42 = vpop.f32.mrb[8].mxu1 }
 0x17a   :  { %v385_v44 = vadd.f32 %v379_v42, %v310_v38  ;;  %v809_v45 = vpop.f32.mrb[9].mxu1 }
 0x17b   :  { %v382_v46 = vpop.f32.mrb[10].mxu1 }
 0x17c   :  { %v391_v47 = vadd.f32 %v711_v43, %v385_v44  ;;  %v810_v48 = vpop.f32.mrb[11].mxu1 }
 0x17e   :  { %v392_v49 = vmax.f32 %v391_v47, 0.0 }
 0x180   :  { %v393_v50 = vpack.c.bf16 %v392_v49, %v392_v49 }
 0x182   :  { %828 = vmatmul.mubr.bf16.vlgmr.msra.gmra.mrb[0].mxu0 %v393_v50 }
 0x183   :  { %867 = vmatprep.mubr.msk.bf16.mxu0 %vm1113_vm0, %v1112_v0  ;;  %852 = vmatpush3.bf16.msra.mxu0 %v909_v53 }
 0x184   :  { %853 = vmatprep.subr.bf16.mxu0 %v1112_v0 }
 0x187   :  { %854 = vmatpush3.bf16.msra.mxu0 %v910_v54 }
 0x188   :  { %855 = vmatprep.subr.bf16.mxu0 %v1112_v0 }
 0x18b   :  { %856 = vmatpush3.bf16.msra.mxu0 %v911_v55 }
 0x18c   :  { %857 = vmatprep.subr.bf16.mxu0 %v1112_v0 }
 0x18f   :  { %858 = vmatpush3.bf16.msra.mxu0 %v912_v56 }
 0x190   :  { %859 = vmatprep.subr.bf16.mxu0 %v1112_v0 }
 0x193   :  { %860 = vmatpush3.bf16.msra.mxu0 %v913_v57 }
 0x194   :  { %861 = vmatprep.subr.bf16.mxu0 %v1112_v0 }
 0x197   :  { %862 = vmatpush3.bf16.msra.mxu0 %v914_v58 }
 0x198   :  { %863 = vmatprep.subr.bf16.mxu0 %v1112_v0 }
 0x19b   :  { %864 = vmatpush3.bf16.msra.mxu0 %v915_v4 }
 0x19c   :  { %865 = vmatprep.subr.bf16.mxu0 %v1112_v0 }
 0x19f   :  { %866 = vmatpush3.bf16.msra.mxu0 %v916_v5 }
 0x255   :  { %v481_v60 = vpop.f32.mrb[0].mxu0 }
 0x256   :  { %v482_v61 = vadd.f32 %v712_v59, %v481_v60  ;;  %v829_v62 = vpop.f32.mrb[1].mxu0 }
 0x257   :  { %v484_v63 = vpop.f32.mrb[2].mxu0 }
 0x258   :  { %v487_v1 = vmax.f32 %v482_v61, 0.0  ;;  %v830_v2 = vpop.f32.mrb[3].mxu0 }
 0x25a   :  { %v488_v3 = vpack.c.bf16 %v487_v1, %v487_v1 }
 0x25c   :  { %848 = vmatmul.mubr.bf16.vlgmr.msra.gmra.mrb[12].mxu1 %v488_v3 }
 0x32f   :  { %v576_v7 = vpop.f32.mrb[12].mxu1 }
 0x330   :  { %v577_v8 = vadd.f32 %v721_v6, %v576_v7  ;;  %v849_v9 = vpop.f32.mrb[13].mxu1 }
 0x331   :  { %v579_v10 = vpop.f32.mrb[14].mxu1 }
 0x332   :  { %v582_v11 = vmax.f32 %v577_v8, 0.0  ;;  %v850_v12 = vpop.f32.mrb[15].mxu1 }
 0x334   :  { %v583_v13 = vpack.c.bf16 %v582_v11, %v582_v11 }
 0x336   :  { %868 = vmatmul.mubr.bf16.vlgmr.msra.gmra.mrb[4].mxu0 %v583_v13 }
 0x409   :  { %v666_v14 = vpop.f32.mrb[4].mxu0 }
 0x40a   :  { %v672_v0 = vadd.f32 %v666_v14, %v582_v11  ;;  %v869_v16 = vpop.f32.mrb[5].mxu0 }
 0x40b   :  { %v669_v17 = vpop.f32.mrb[6].mxu0 }
 0x40c   :  { %v678_v18 = vadd.f32 %v738_v15, %v672_v0  ;;  %v870_v19 = vpop.f32.mrb[7].mxu0 }
 0x40e   :  { %679 = vst [vmem:[#allocation14] sm:$0xff] %v678_v18 }
 0x40f   :  { %1082 = shalt.err (!%p1079_p4)
}
 0x410   :  { %s1083_s7 = scalar_lea.hbm %s1348_s8, 128 }
 0x411   :  { %p1084_p5 = scmp.ne.s32.totalorder %s1348_s8, %s1083_s7  ;;  %p1087_p6 = scmp.lt.u32.totalorder %s1083_s7, %s1348_s8 }
 0x413   :  { %p1089_p7 = pnand %p1087_p6, %p1084_p5 }
 0x415   :  { %1092 = shalt.err (!%p1089_p7)
}
 0x416   :  { %689 = dma.vmem_to_hbm [thread:$0]  %s687_s23, 128, %s1348_s8, [#allocation4]  }
 0x417   :  { %1101 = dma.done.wait [#allocation4], 128  }
 0x418   :  { %1102 = vsyncadd [#allocation4], 4294967168 }
 0x419   :  { %693 = vsyncpa [#allocation3], 1 }
 0x41a   :  { %694 = vsyncpa [#allocation6], 1 }
 0x41b   :  { %695 = vsyncpa [#allocation9], 1 }
 0x41c   :  { %696 = vsyncpa [#allocation12], 1 }
 0x41d   :  { %697 = vsyncpa [#allocation4], 1 }

</bundles_post_ra>
